<compile_context>
chip_gen: v7x
topology: tpu7x:2x2x1
jax: 0.10.0
libtpu: 0.0.40
codegen_flags: <defaults>
</compile_context>

<pallas_src>
import math

import jax
import jax.numpy as jnp
import numpy as np
from jax.experimental import pallas as pl
from jax.experimental.pallas import tpu as pltpu

# ---- small, TPU-friendly shapes consistent with the module -----------------
B = 8            # batch
S = 16           # sequence length
D_MODEL = 128    # d_model (768 in the original; 128 keeps one lane tile)
N_DOMAINS = 2
N_VIEWS = N_DOMAINS + 1   # domain views + shared BERT view
N_CLASSES = 2
VOCAB = 100

# packed-output column layout: [ loss | logits (C) | attn (NV) | zero pad ]
_LOSS_COL = 0
_LOGIT_COL = 1
_ATTN_COL = 1 + N_CLASSES
_PAD = D_MODEL - (1 + N_CLASSES + N_VIEWS)


def mvt_fused_kernel(emb_ref, pool_ref, wviews_ref, q_ref, kt_ref, v_ref,
                     wc_ref, bc_ref, onehot_ref, out_ref):
    """Pooling + stand-in encoders + multi-view attention + classifier + CE.

    emb_ref    : [B*S, D]        token embeddings, bf16 (flattened [B,S,D])
    pool_ref   : [B, B*S]        masked-mean pooling matrix, bf16
    wviews_ref : [D, N_VIEWS*D]  concatenated stand-in per-view encoder weights, bf16
    q_ref      : [D, D]          self.Q, bf16
    kt_ref     : [D, D]          self.K transposed, bf16
    v_ref      : [D, D]          self.V, bf16
    wc_ref     : [D, C]          task_classifier.weight.T, bf16
    bc_ref     : [1, C]          task_classifier.bias, f32
    onehot_ref : [B, C]          one-hot labels, f32
    out_ref    : [B, D]          packed f32 output slab (loss | logits | attn | pad)
    """
    f32 = jnp.float32
    bf16 = jnp.bfloat16

    # ---- masked-mean pooling as one MXU matmul: feat = P @ embs -------------
    feat = jnp.dot(pool_ref[...], emb_ref[...], preferred_element_type=f32)   # [B, D]

    # ---- fused stand-in per-view encoders: one wide matmul + tanh -----------
    hidden = jnp.tanh(
        jnp.dot(feat.astype(bf16), wviews_ref[...], preferred_element_type=f32)
    )                                                                          # [B, NV*D]
    v0 = hidden[:, 0:D_MODEL]                    # domain view 0
    v1 = hidden[:, D_MODEL:2 * D_MODEL]          # domain view 1
    v2 = hidden[:, 2 * D_MODEL:3 * D_MODEL]      # shared (BERT) view

    # ---- q = shared @ Q ; kq = q @ K^T   (score_n = <view_n @ K, q> = <view_n, kq>)
    q = jnp.dot(v2.astype(bf16), q_ref[...], preferred_element_type=f32)       # [B, D]
    kq = jnp.dot(q.astype(bf16), kt_ref[...], preferred_element_type=f32)      # [B, D]

    scale = 1.0 / math.sqrt(float(D_MODEL))      # / sqrt(dim_param)
    s0 = jnp.sum(v0 * kq, axis=-1, keepdims=True) * scale                      # [B, 1]
    s1 = jnp.sum(v1 * kq, axis=-1, keepdims=True) * scale
    s2 = jnp.sum(v2 * kq, axis=-1, keepdims=True) * scale

    # ---- softmax over the 3 views, computed scalar-wise (no concat) ---------
    m = jnp.maximum(jnp.maximum(s0, s1), s2)
    e0 = jnp.exp(s0 - m)
    e1 = jnp.exp(s1 - m)
    e2 = jnp.exp(s2 - m)
    inv = pl.reciprocal(e0 + e1 + e2, approx=True)
    a0 = e0 * inv
    a1 = e1 * inv
    a2 = e2 * inv

    # ---- fold attention into the views first (VPU), then ONE V projection ---
    combined = a0 * v0 + a1 * v1 + a2 * v2                                     # [B, D]
    o = jnp.dot(combined.astype(bf16), v_ref[...], preferred_element_type=f32)

    # ---- logits = task_classifier(o) -----------------------------------------
    logits = (jnp.dot(o.astype(bf16), wc_ref[...], preferred_element_type=f32)
              + bc_ref[...])                                                   # [B, C]

    # ---- cross-entropy loss (mean over batch), all in f32 --------------------
    lm = jnp.max(logits, axis=-1, keepdims=True)
    lse = jnp.log(jnp.sum(jnp.exp(logits - lm), axis=-1, keepdims=True)) + lm
    nll = lse - jnp.sum(onehot_ref[...] * logits, axis=-1, keepdims=True)      # [B, 1]
    loss = jnp.mean(nll)

    # ---- pack everything into one lane-dense [B, 128] f32 slab ---------------
    loss_col = jnp.zeros((B, 1), f32) + loss
    packed = jnp.concatenate(
        [loss_col, logits, a0, a1, a2, jnp.zeros((B, _PAD), f32)], axis=-1)    # [B, D]
    out_ref[...] = packed


def multi_view_forward(embs, attention_mask, w_views, Q, K, V, w_cls, b_cls, labels):
    """Wrapper: single kernel invocation (no grid), everything resident in VMEM."""
    bf16 = jnp.bfloat16

    # pooling matrix P[b, b*S + s] = mask[b, s] / count[b]  (tiny XLA prep)
    block = attention_mask / jnp.maximum(
        jnp.sum(attention_mask, axis=1, keepdims=True), 1.0)                   # [B, S]
    pool = (jnp.eye(B, dtype=jnp.float32)[:, :, None]
            * block[:, None, :]).reshape(B, B * S)                             # [B, B*S]

    emb2d = embs.reshape(B * S, D_MODEL).astype(bf16)
    pool = pool.astype(bf16)
    wviews_cat = jnp.concatenate(
        [w_views[n] for n in range(N_VIEWS)], axis=1).astype(bf16)             # [D, NV*D]
    Qb = Q.astype(bf16)
    KTb = K.T.astype(bf16)
    Vb = V.astype(bf16)
    wcb = w_cls.astype(bf16)
    bc2 = b_cls.reshape(1, N_CLASSES).astype(jnp.float32)
    onehot = jax.nn.one_hot(labels, N_CLASSES, dtype=jnp.float32)

    vmem = pl.BlockSpec(memory_space=pltpu.MemorySpace.VMEM)
    packed = pl.pallas_call(
        mvt_fused_kernel,
        out_shape=jax.ShapeDtypeStruct((B, D_MODEL), jnp.float32),
        in_specs=[vmem] * 9,
        out_specs=vmem,
        compiler_params=pltpu.CompilerParams(vmem_limit_bytes=32 * 1024 * 1024),
    )(emb2d, pool, wviews_cat, Qb, KTb, Vb, wcb, bc2, onehot)

    loss = packed[0, _LOSS_COL]
    logits = packed[:, _LOGIT_COL:_LOGIT_COL + N_CLASSES]
    attn = packed[:, _ATTN_COL:_ATTN_COL + N_VIEWS]
    return loss, logits, attn


def reference_forward(embs, attention_mask, w_views, Q, K, V, w_cls, b_cls, labels):
    """Plain-JAX f32 reference mirroring the PyTorch math (for a sanity check)."""
    mask = attention_mask[..., None]
    feat = jnp.sum(embs * mask, axis=1) / jnp.maximum(jnp.sum(mask, axis=1), 1.0)
    views = jnp.stack([jnp.tanh(feat @ w_views[n]) for n in range(N_VIEWS)], axis=1)
    shared = views[:, -1, :]
    q = shared @ Q
    k = views.reshape(-1, D_MODEL) @ K
    attn = jnp.sum(k.reshape(-1, N_VIEWS, D_MODEL) * q[:, None, :], axis=-1)
    attn = jax.nn.softmax(attn / jnp.sqrt(jnp.float32(D_MODEL)), axis=-1)
    v = (views.reshape(-1, D_MODEL) @ V).reshape(-1, N_VIEWS, D_MODEL)
    o = jnp.sum(attn[..., None] * v, axis=1)
    logits = o @ w_cls + b_cls
    onehot = jax.nn.one_hot(labels, N_CLASSES, dtype=jnp.float32)
    lse = jax.scipy.special.logsumexp(logits, axis=-1)
    loss = jnp.mean(lse - jnp.sum(onehot * logits, axis=-1))
    return loss, logits, attn


if __name__ == "__main__":
    key = jax.random.PRNGKey(0)
    (k_emb, k_ids, k_mask, k_lab, k_views,
     k_q, k_k, k_v, k_cls) = jax.random.split(key, 9)

    # ---- synthetic inputs ----------------------------------------------------
    input_ids = jax.random.randint(k_ids, (B, S), 0, VOCAB, dtype=jnp.int32)
    attention_mask = (jax.random.uniform(k_mask, (B, S)) > 0.2).astype(jnp.float32)
    attention_mask = attention_mask.at[:, 0].set(1.0)          # keep CLS position
    labels = jax.random.randint(k_lab, (B,), 0, N_CLASSES, dtype=jnp.int32)

    # ---- deterministic parameters -------------------------------------------
    emb_table = 0.02 * jax.random.normal(k_emb, (VOCAB, D_MODEL), jnp.float32)
    w_views = 0.05 * jax.random.normal(k_views, (N_VIEWS, D_MODEL, D_MODEL), jnp.float32)

    xav = math.sqrt(6.0 / (D_MODEL + D_MODEL))                  # xavier_uniform_
    Q = jax.random.uniform(k_q, (D_MODEL, D_MODEL), jnp.float32, -xav, xav)
    K = jax.random.uniform(k_k, (D_MODEL, D_MODEL), jnp.float32, -xav, xav)
    V = jax.random.uniform(k_v, (D_MODEL, D_MODEL), jnp.float32, -xav, xav)

    cls_bound = 1.0 / math.sqrt(D_MODEL)                        # nn.Linear default init
    w_cls = jax.random.uniform(k_cls, (D_MODEL, N_CLASSES), jnp.float32,
                               -cls_bound, cls_bound)
    b_cls = jnp.zeros((N_CLASSES,), jnp.float32)

    # ---- glue: embedding gather stays in XLA (pooling runs inside the kernel)
    embs = emb_table[input_ids]                                  # [B, S, D]

    # ---- run the Pallas kernel ----------------------------------------------
    loss, logits, attn = multi_view_forward(
        embs, attention_mask, w_views, Q, K, V, w_cls, b_cls, labels)
    jax.block_until_ready((loss, logits, attn))

    # ---- sanity check against the plain-JAX f32 reference --------------------
    ref_loss, ref_logits, ref_attn = reference_forward(
        embs, attention_mask, w_views, Q, K, V, w_cls, b_cls, labels)
    np.testing.assert_allclose(np.asarray(logits), np.asarray(ref_logits),
                               rtol=2e-2, atol=2e-2)
    np.testing.assert_allclose(np.asarray(attn), np.asarray(ref_attn),
                               rtol=2e-2, atol=2e-2)
    np.testing.assert_allclose(np.asarray(loss), np.asarray(ref_loss),
                               rtol=2e-2, atol=2e-2)

    print("KERNEL_OK")
</pallas_src>

<mosaic_0001>
module attributes {stable_mosaic.version = 11 : i64} {
  func.func @mvt_fused_kernel(%arg0: memref<128x128xbf16, #tpu.memory_space<vmem>>, %arg1: memref<8x128xbf16, #tpu.memory_space<vmem>>, %arg2: memref<128x384xbf16, #tpu.memory_space<vmem>>, %arg3: memref<128x128xbf16, #tpu.memory_space<vmem>>, %arg4: memref<128x128xbf16, #tpu.memory_space<vmem>>, %arg5: memref<128x128xbf16, #tpu.memory_space<vmem>>, %arg6: memref<128x2xbf16, #tpu.memory_space<vmem>>, %arg7: memref<1x2xf32, #tpu.memory_space<vmem>>, %arg8: memref<8x2xf32, #tpu.memory_space<vmem>>, %arg9: memref<8x128xf32, #tpu.memory_space<vmem>>) attributes {dimension_semantics = [], scalar_prefetch = 0 : i64, scratch_operands = 0 : i64, tpu.core_type = #tpu.core_type<tc>} {
    %c0 = arith.constant 0 : index
    %c0_0 = arith.constant 0 : index
    %0 = vector.load %arg1[%c0, %c0_0] : memref<8x128xbf16, #tpu.memory_space<vmem>>, vector<8x128xbf16>
    %c0_1 = arith.constant 0 : index
    %c0_2 = arith.constant 0 : index
    %1 = vector.load %arg0[%c0_1, %c0_2] : memref<128x128xbf16, #tpu.memory_space<vmem>>, vector<128x128xbf16>
    %cst = arith.constant dense<0.000000e+00> : vector<8x128xf32>
    %2 = tpu.matmul %0, %1, %cst {dimension_numbers = #tpu.dot_dimension_numbers<[1], [0], [0], [1], [0, 0, 1, 1], [], []>} : vector<8x128xbf16>, vector<128x128xbf16>, vector<8x128xf32> -> vector<8x128xf32>
    %3 = arith.truncf %2 : vector<8x128xf32> to vector<8x128xbf16>
    %c0_3 = arith.constant 0 : index
    %c0_4 = arith.constant 0 : index
    %4 = vector.load %arg2[%c0_3, %c0_4] : memref<128x384xbf16, #tpu.memory_space<vmem>>, vector<128x384xbf16>
    %cst_5 = arith.constant dense<0.000000e+00> : vector<8x384xf32>
    %5 = tpu.matmul %3, %4, %cst_5 {dimension_numbers = #tpu.dot_dimension_numbers<[1], [0], [0], [1], [0, 0, 1, 1], [], []>} : vector<8x128xbf16>, vector<128x384xbf16>, vector<8x384xf32> -> vector<8x384xf32>
    %6 = math.tanh %5 : vector<8x384xf32>
    %7 = vector.extract_strided_slice %6 {offsets = [0, 0], sizes = [8, 128], strides = [1, 1]} : vector<8x384xf32> to vector<8x128xf32>
    %8 = vector.extract_strided_slice %6 {offsets = [0, 128], sizes = [8, 128], strides = [1, 1]} : vector<8x384xf32> to vector<8x128xf32>
    %9 = vector.extract_strided_slice %6 {offsets = [0, 256], sizes = [8, 128], strides = [1, 1]} : vector<8x384xf32> to vector<8x128xf32>
    %10 = arith.truncf %9 : vector<8x128xf32> to vector<8x128xbf16>
    %c0_6 = arith.constant 0 : index
    %c0_7 = arith.constant 0 : index
    %11 = vector.load %arg3[%c0_6, %c0_7] : memref<128x128xbf16, #tpu.memory_space<vmem>>, vector<128x128xbf16>
    %cst_8 = arith.constant dense<0.000000e+00> : vector<8x128xf32>
    %12 = tpu.matmul %10, %11, %cst_8 {dimension_numbers = #tpu.dot_dimension_numbers<[1], [0], [0], [1], [0, 0, 1, 1], [], []>} : vector<8x128xbf16>, vector<128x128xbf16>, vector<8x128xf32> -> vector<8x128xf32>
    %13 = arith.truncf %12 : vector<8x128xf32> to vector<8x128xbf16>
    %c0_9 = arith.constant 0 : index
    %c0_10 = arith.constant 0 : index
    %14 = vector.load %arg4[%c0_9, %c0_10] : memref<128x128xbf16, #tpu.memory_space<vmem>>, vector<128x128xbf16>
    %cst_11 = arith.constant dense<0.000000e+00> : vector<8x128xf32>
    %15 = tpu.matmul %13, %14, %cst_11 {dimension_numbers = #tpu.dot_dimension_numbers<[1], [0], [0], [1], [0, 0, 1, 1], [], []>} : vector<8x128xbf16>, vector<128x128xbf16>, vector<8x128xf32> -> vector<8x128xf32>
    %16 = arith.mulf %7, %15 : vector<8x128xf32>
    %cst_12 = arith.constant dense<0.000000e+00> : vector<8xf32>
    %17 = vector.multi_reduction <add>, %16, %cst_12 [1] : vector<8x128xf32> to vector<8xf32>
    %18 = vector.shape_cast %17 : vector<8xf32> to vector<8x1xf32>
    %cst_13 = arith.constant 0.0883883461 : f32
    %19 = vector.broadcast %cst_13 : f32 to vector<8x1xf32>
    %20 = arith.mulf %18, %19 : vector<8x1xf32>
    %21 = arith.mulf %8, %15 : vector<8x128xf32>
    %cst_14 = arith.constant dense<0.000000e+00> : vector<8xf32>
    %22 = vector.multi_reduction <add>, %21, %cst_14 [1] : vector<8x128xf32> to vector<8xf32>
    %23 = vector.shape_cast %22 : vector<8xf32> to vector<8x1xf32>
    %cst_15 = arith.constant 0.0883883461 : f32
    %24 = vector.broadcast %cst_15 : f32 to vector<8x1xf32>
    %25 = arith.mulf %23, %24 : vector<8x1xf32>
    %26 = arith.mulf %9, %15 : vector<8x128xf32>
    %cst_16 = arith.constant dense<0.000000e+00> : vector<8xf32>
    %27 = vector.multi_reduction <add>, %26, %cst_16 [1] : vector<8x128xf32> to vector<8xf32>
    %28 = vector.shape_cast %27 : vector<8xf32> to vector<8x1xf32>
    %cst_17 = arith.constant 0.0883883461 : f32
    %29 = vector.broadcast %cst_17 : f32 to vector<8x1xf32>
    %30 = arith.mulf %28, %29 : vector<8x1xf32>
    %31 = arith.maximumf %20, %25 : vector<8x1xf32>
    %32 = arith.maximumf %31, %30 : vector<8x1xf32>
    %33 = arith.subf %20, %32 : vector<8x1xf32>
    %34 = math.exp %33 : vector<8x1xf32>
    %35 = arith.subf %25, %32 : vector<8x1xf32>
    %36 = math.exp %35 : vector<8x1xf32>
    %37 = arith.subf %30, %32 : vector<8x1xf32>
    %38 = math.exp %37 : vector<8x1xf32>
    %39 = arith.addf %34, %36 : vector<8x1xf32>
    %40 = arith.addf %39, %38 : vector<8x1xf32>
    %41 = tpu.reciprocal %40 {approx = true} : vector<8x1xf32> -> vector<8x1xf32>
    %42 = arith.mulf %34, %41 : vector<8x1xf32>
    %43 = arith.mulf %36, %41 : vector<8x1xf32>
    %44 = arith.mulf %38, %41 : vector<8x1xf32>
    %45 = vector.broadcast %42 : vector<8x1xf32> to vector<8x128xf32>
    %46 = arith.mulf %45, %7 : vector<8x128xf32>
    %47 = vector.broadcast %43 : vector<8x1xf32> to vector<8x128xf32>
    %48 = arith.mulf %47, %8 : vector<8x128xf32>
    %49 = arith.addf %46, %48 : vector<8x128xf32>
    %50 = vector.broadcast %44 : vector<8x1xf32> to vector<8x128xf32>
    %51 = arith.mulf %50, %9 : vector<8x128xf32>
    %52 = arith.addf %49, %51 : vector<8x128xf32>
    %53 = arith.truncf %52 : vector<8x128xf32> to vector<8x128xbf16>
    %c0_18 = arith.constant 0 : index
    %c0_19 = arith.constant 0 : index
    %54 = vector.load %arg5[%c0_18, %c0_19] : memref<128x128xbf16, #tpu.memory_space<vmem>>, vector<128x128xbf16>
    %cst_20 = arith.constant dense<0.000000e+00> : vector<8x128xf32>
    %55 = tpu.matmul %53, %54, %cst_20 {dimension_numbers = #tpu.dot_dimension_numbers<[1], [0], [0], [1], [0, 0, 1, 1], [], []>} : vector<8x128xbf16>, vector<128x128xbf16>, vector<8x128xf32> -> vector<8x128xf32>
    %56 = arith.truncf %55 : vector<8x128xf32> to vector<8x128xbf16>
    %c0_21 = arith.constant 0 : index
    %c0_22 = arith.constant 0 : index
    %57 = vector.load %arg6[%c0_21, %c0_22] : memref<128x2xbf16, #tpu.memory_space<vmem>>, vector<128x2xbf16>
    %cst_23 = arith.constant dense<0.000000e+00> : vector<8x2xf32>
    %58 = tpu.matmul %56, %57, %cst_23 {dimension_numbers = #tpu.dot_dimension_numbers<[1], [0], [0], [1], [0, 0, 1, 1], [], []>} : vector<8x128xbf16>, vector<128x2xbf16>, vector<8x2xf32> -> vector<8x2xf32>
    %c0_24 = arith.constant 0 : index
    %c0_25 = arith.constant 0 : index
    %59 = vector.load %arg7[%c0_24, %c0_25] : memref<1x2xf32, #tpu.memory_space<vmem>>, vector<1x2xf32>
    %60 = vector.broadcast %59 : vector<1x2xf32> to vector<8x2xf32>
    %61 = arith.addf %58, %60 : vector<8x2xf32>
    %cst_26 = arith.constant dense<0xFF800000> : vector<8xf32>
    %62 = vector.multi_reduction <maximumf>, %61, %cst_26 [1] : vector<8x2xf32> to vector<8xf32>
    %63 = vector.shape_cast %62 : vector<8xf32> to vector<8x1xf32>
    %64 = vector.broadcast %63 : vector<8x1xf32> to vector<8x2xf32>
    %65 = arith.subf %61, %64 : vector<8x2xf32>
    %66 = math.exp %65 : vector<8x2xf32>
    %cst_27 = arith.constant dense<0.000000e+00> : vector<8xf32>
    %67 = vector.multi_reduction <add>, %66, %cst_27 [1] : vector<8x2xf32> to vector<8xf32>
    %68 = vector.shape_cast %67 : vector<8xf32> to vector<8x1xf32>
    %69 = math.log %68 : vector<8x1xf32>
    %70 = arith.addf %69, %63 : vector<8x1xf32>
    %c0_28 = arith.constant 0 : index
    %c0_29 = arith.constant 0 : index
    %71 = vector.load %arg8[%c0_28, %c0_29] : memref<8x2xf32, #tpu.memory_space<vmem>>, vector<8x2xf32>
    %72 = arith.mulf %71, %61 : vector<8x2xf32>
    %cst_30 = arith.constant dense<0.000000e+00> : vector<8xf32>
    %73 = vector.multi_reduction <add>, %72, %cst_30 [1] : vector<8x2xf32> to vector<8xf32>
    %74 = vector.shape_cast %73 : vector<8xf32> to vector<8x1xf32>
    %75 = arith.subf %70, %74 : vector<8x1xf32>
    %76 = vector.shape_cast %75 : vector<8x1xf32> to vector<1x8x1xf32>
    %cst_31 = arith.constant dense<0.000000e+00> : vector<1xf32>
    %77 = vector.multi_reduction <add>, %76, %cst_31 [1, 2] : vector<1x8x1xf32> to vector<1xf32>
    %78 = vector.shape_cast %77 : vector<1xf32> to vector<1x1x1xf32>
    %79 = vector.extract %78[0, 0, 0] : f32 from vector<1x1x1xf32>
    %cst_32 = arith.constant 8.000000e+00 : f32
    %80 = arith.divf %79, %cst_32 : f32
    %cst_33 = arith.constant 0.000000e+00 : f32
    %81 = vector.broadcast %cst_33 : f32 to vector<8x1xf32>
    %82 = vector.broadcast %80 : f32 to vector<8x1xf32>
    %83 = arith.addf %81, %82 : vector<8x1xf32>
    %cst_34 = arith.constant 0.000000e+00 : f32
    %84 = vector.broadcast %cst_34 : f32 to vector<8x122xf32>
    %85 = tpu.concatenate %83, %61, %42, %43, %44, %84 in 1 : vector<8x1xf32>, vector<8x2xf32>, vector<8x1xf32>, vector<8x1xf32>, vector<8x1xf32>, vector<8x122xf32> -> vector<8x128xf32>
    %c0_35 = arith.constant 0 : index
    %c0_36 = arith.constant 0 : index
    %86 = vector.load %arg9[%c0_35, %c0_36] : memref<8x128xf32, #tpu.memory_space<vmem>>, vector<8x128xf32>
    tpu.vector_store %arg9[%c0_35, %c0_36], %85 {strides = array<i32>} : memref<8x128xf32, #tpu.memory_space<vmem>>, vector<8x128xf32>,
    return
  }
}

</mosaic_0001>

<bundles_post_ra>
// kernel: tpu_custom_call.1
= control target key start
LH: loop header
LB: loop body
LE: loop exit
PB: predicated region body
PF: predicated region fallthrough
CT: control target
= control target key end

     0   :  { %14 = vsyncpa [#allocation3], 0  ;;  %s1715_s0 = inlined_call_operand.vmem [shape: bf16[128,128], index: 0, kind: input, shape index: {}]   ;;  %s1716_s1 = inlined_call_operand.vmem [shape: bf16[8,128], index: 1, kind: input, shape index: {}]   ;;  %s1717_s2 = inlined_call_operand.hbm [shape: bf16[128,384], index: 2, kind: input, shape index: {}]   ;;  %s1718_s3 = inlined_call_operand.hbm [shape: bf16[128,128], index: 3, kind: input, shape index: {}]   ;;  %s1719_s4 = inlined_call_operand.hbm [shape: bf16[128,128], index: 4, kind: input, shape index: {}]   ;;  %s1720_s5 = inlined_call_operand.hbm [shape: bf16[128,128], index: 5, kind: input, shape index: {}]   ;;  %s1721_s6 = inlined_call_operand.vmem [shape: bf16[128,2], index: 6, kind: input, shape index: {}]   ;;  %s1722_s7 = inlined_call_operand.vmem [shape: f32[1,2], index: 7, kind: input, shape index: {}]   ;;  %s1723_s8 = inlined_call_operand.vmem [shape: f32[8,2], index: 8, kind: input, shape index: {}]   ;;  %s1724_s9 = inlined_call_operand.hbm [shape: f32[8,128], index: 9, kind: output, shape index: {}]  }
   0x1   :  { %15 = vsyncpa [#allocation6], 0 }
   0x2   :  { %16 = vsyncpa [#allocation9], 0 }
   0x3   :  { %17 = vsyncpa [#allocation4], 0  ;;  %s1428_s30 = smov [#allocation5]   ;;  %s1310_s13 = scalar_lea.hbm %s1718_s3, 1024 }
   0x4   :  { %s39_s10 = sshll.u32 %s1428_s30, 4  ;;  %p1311_p0 = scmp.ne.s32.totalorder %s1718_s3, %s1310_s13  ;;  %s40_s10 = int_to_ptr.vmem [resolvable:$true] %s39_s10 }
   0x5   :  { %p1314_p1 = scmp.lt.u32.totalorder %s1310_s13, %s1718_s3 }
   0x7   :  { %p1316_p2 = pnand %p1314_p1, %p1311_p0 }
   0x9   :  { %1319 = shalt.err (!%p1316_p2)
}
   0xa   :  { %s1320_s18 = scalar_lea.vmem %s40_s10, 1024  ;;  %p1325_p4 = scmp.lt.s32.totalorder %s40_s10, %s40_s10 }
   0xb   :  { %p1321_p3 = scmp.ne.s32.totalorder %s40_s10, %s1320_s18  ;;  %p1326_p5 = scmp.lt.s32.totalorder %s1320_s18, %s1320_s18 }
   0xd   :  { %p1327_p6 = por %p1326_p5, %p1325_p4 }
   0xf   :  { %p1328_p7 = pnand %p1327_p6, %p1321_p3 }
  0x11   :  { %1331 = shalt.err (!%p1328_p7)
}
  0x12   :  { %s1429_s19 = smov 64   ;;  %s1430_s20 = smov 4  }
  0x13   :  { %45 = dma.hbm_to_vmem [thread:$0]  %s1718_s3, 1024, %s40_s10, [#allocation6], %s1429_s19, %s1429_s19, %s1430_s20  }
  0x14   :  { %s1431_s23 = smov [#allocation2]   ;;  %s1332_s27 = scalar_lea.hbm %s1717_s2, 3072 }
  0x15   :  { %s27_s24 = sshll.u32 %s1431_s23, 4  ;;  %p1333_p8 = scmp.ne.s32.totalorder %s1717_s2, %s1332_s27  ;;  %s28_s24 = int_to_ptr.vmem [resolvable:$true] %s27_s24 }
  0x16   :  { %p1336_p9 = scmp.lt.u32.totalorder %s1332_s27, %s1717_s2 }
  0x18   :  { %p1338_p10 = pnand %p1336_p9, %p1333_p8 }
  0x1a   :  { %1341 = shalt.err (!%p1338_p10)
}
  0x1b   :  { %s1342_s12 = scalar_lea.vmem %s28_s24, 3072  ;;  %p1347_p12 = scmp.lt.s32.totalorder %s28_s24, %s28_s24 }
  0x1c   :  { %p1343_p11 = scmp.ne.s32.totalorder %s28_s24, %s1342_s12  ;;  %p1348_p13 = scmp.lt.s32.totalorder %s1342_s12, %s1342_s12 }
  0x1e   :  { %p1349_p0 = por %p1348_p13, %p1347_p12 }
  0x20   :  { %p1350_p1 = pnand %p1349_p0, %p1343_p11 }
  0x22   :  { %1353 = shalt.err (!%p1350_p1)
}
  0x23   :  { %s1432_s3 = smov 192   ;;  %s1433_s10 = smov 12  }
  0x24   :  { %33 = dma.hbm_to_vmem [thread:$0]  %s1717_s2, 3072, %s28_s24, [#allocation3], %s1432_s3, %s1432_s3, %s1433_s10  }
  0x25   :  { %s1434_s15 = smov [#allocation7]   ;;  %s1435_s17 = smov [#allocation8]  }
  0x26   :  { %s51_s16 = sshll.u32 %s1434_s15, 4  ;;  %s63_s18 = sshll.u32 %s1435_s17, 4  ;;  %s52_s16 = int_to_ptr.vmem [resolvable:$true] %s51_s16  ;;  %s1518_s18 = int_to_ptr.vmem [resolvable:$true] %s63_s18 }
  0x27   :  { %s1354_s23 = scalar_lea.hbm %s1719_s4, 1024 }
  0x28   :  { %p1355_p2 = scmp.ne.s32.totalorder %s1719_s4, %s1354_s23  ;;  %p1358_p3 = scmp.lt.u32.totalorder %s1354_s23, %s1719_s4 }
  0x2a   :  { %p1360_p4 = pnand %p1358_p3, %p1355_p2 }
  0x2c   :  { %1363 = shalt.err (!%p1360_p4)
}
  0x2d   :  { %s1364_s2 = scalar_lea.vmem %s52_s16, 1024  ;;  %p1369_p6 = scmp.lt.s32.totalorder %s52_s16, %s52_s16 }
  0x2e   :  { %p1365_p5 = scmp.ne.s32.totalorder %s52_s16, %s1364_s2  ;;  %p1370_p7 = scmp.lt.s32.totalorder %s1364_s2, %s1364_s2 }
  0x30   :  { %p1371_p8 = por %p1370_p7, %p1369_p6 }
  0x32   :  { %p1372_p9 = pnand %p1371_p8, %p1365_p5 }
  0x34   :  { %1375 = shalt.err (!%p1372_p9)
}
  0x35   :  { %57 = dma.hbm_to_vmem [thread:$0]  %s1719_s4, 1024, %s52_s16, [#allocation6], %s1429_s19, %s1429_s19, %s1430_s20  }
  0x36   :  { %s1376_s12 = scalar_lea.hbm %s1720_s5, 1024 }
  0x37   :  { %p1377_p10 = scmp.ne.s32.totalorder %s1720_s5, %s1376_s12  ;;  %p1380_p11 = scmp.lt.u32.totalorder %s1376_s12, %s1720_s5 }
  0x39   :  { %p1382_p12 = pnand %p1380_p11, %p1377_p10 }
  0x3b   :  { %1385 = shalt.err (!%p1382_p12)
}
  0x3c   :  { %s1386_s15 = scalar_lea.vmem %s1518_s18, 1024  ;;  %p1391_p0 = scmp.lt.s32.totalorder %s1518_s18, %s1518_s18 }
  0x3d   :  { %p1387_p13 = scmp.ne.s32.totalorder %s1518_s18, %s1386_s15  ;;  %p1392_p1 = scmp.lt.s32.totalorder %s1386_s15, %s1386_s15 }
  0x3f   :  { %p1393_p2 = por %p1392_p1, %p1391_p0 }
  0x41   :  { %p1394_p3 = pnand %p1393_p2, %p1387_p13 }
  0x43   :  { %1397 = shalt.err (!%p1394_p3)
}
  0x44   :  { %69 = dma.hbm_to_vmem [thread:$0]  %s1720_s5, 1024, %s1518_s18, [#allocation9], %s1429_s19, %s1429_s19, %s1430_s20  }
  0x45   :  { %1420 = dma.done.wait [#allocation3], 3072  }
  0x46   :  { %1421 = vsyncadd [#allocation3], 4294964224 }
  0x47   :  { %1422 = dma.done.wait [#allocation6], 2048  }
  0x48   :  { %1423 = vsyncadd [#allocation6], 4294965248 }
  0x49   :  { %1424 = dma.done.wait [#allocation9], 1024  }
  0x4a   :  { %1425 = vsyncadd [#allocation9], 4294966272  ;;  %v1436_v0 = vmov 0.0   ;;  %vm1437_vm0 = vmmov 0   ;;  %v1220_v1 = vld [vmem:[%s1715_s0] sm:$0xff]   ;;  %v1221_v2 = vld [vmem:[%s1715_s0 + $0x8] sm:$0xff]  }
  0x4b   :  { %1085 = vmatprep.subr.bf16.mxu0 %v1436_v0  ;;  %1101 = vmatprep.mubr.msk.bf16.mxu0 %vm1437_vm0, %v1436_v0  ;;  %v1222_v3 = vld [vmem:[%s1715_s0 + $0x10] sm:$0xff]   ;;  %v1230_v5 = vld [vmem:[#allocation2] ss:$12 sps:$4 sm:$0xff]   ;;  %v1223_v6 = vld [vmem:[%s1715_s0 + $0x18] sm:$0xff]   ;;  %v1438_v34 = vmov 0   ;;  %vm900_vm1 = vcmask 15360  }
  0x4c   :  { %1086 = vmatpush3.bf16.msra.mxu0 %v1220_v1  ;;  %v1228_v4 = vld [vmem:[#allocation2 + $0x4] ss:$12 sps:$4 sm:$0xff]   ;;  %v1232_v7 = vld [vmem:[#allocation2 + $0x1c] ss:$12 sps:$4 sm:$0xff]   ;;  %v1236_v9 = vld [vmem:[#allocation2 + $0x34] ss:$12 sps:$4 sm:$0xff]   ;;  %387 = vmatprep.mubr.bf16.mxu1 %v1438_v34 }
  0x4d   :  { %1087 = vmatprep.subr.bf16.mxu0 %v1436_v0  ;;  %355 = vmatprep.subr.bf16.mxu1 %v1228_v4  ;;  %v1234_v8 = vld [vmem:[#allocation2 + $0x18] ss:$12 sps:$4 sm:$0xff]   ;;  %v1238_v11 = vld [vmem:[#allocation2 + $0x30] ss:$12 sps:$4 sm:$0xff]   ;;  %v1225_v13 = vld [vmem:[%s1715_s0 + $0x28] sm:$0xff]   ;;  %vm919_vm2 = vcmask 7168  }
  0x4e   :  { %356 = vmatpush1.bf16.msra.mxu1 %v1230_v5  ;;  %v1224_v10 = vld [vmem:[%s1715_s0 + $0x20] sm:$0xff]   ;;  %v1240_v12 = vld [vmem:[#allocation2 + $0x4c] ss:$12 sps:$4 sm:$0xff]   ;;  %v1242_v14 = vld [vmem:[#allocation2 + $0x48] ss:$12 sps:$4 sm:$0xff]   ;;  %vm940_vm3 = vcmask 23552  }
  0x4f   :  { %357 = vmatprep.subr.bf16.mxu1 %v1232_v7  ;;  %v1244_v15 = vld [vmem:[#allocation2 + $0x64] ss:$12 sps:$4 sm:$0xff]   ;;  %v1227_v17 = vld [vmem:[%s1715_s0 + $0x38] sm:$0xff]   ;;  %v1246_v18 = vld [vmem:[#allocation2 + $0x60] ss:$12 sps:$4 sm:$0xff]   ;;  %vm942_vm4 = vcmask 31744  }
  0x50   :  { %1088 = vmatpush3.bf16.msra.mxu0 %v1221_v2  ;;  %v1226_v16 = vld [vmem:[%s1715_s0 + $0x30] sm:$0xff]   ;;  %v1248_v19 = vld [vmem:[#allocation2 + $0x7c] ss:$12 sps:$4 sm:$0xff]   ;;  %v1250_v20 = vld [vmem:[#allocation2 + $0x78] ss:$12 sps:$4 sm:$0xff]   ;;  %vm944_vm5 = vcmask 39936  }
  0x51   :  { %1089 = vmatprep.subr.bf16.mxu0 %v1436_v0  ;;  %v1252_v21 = vld [vmem:[#allocation2 + $0x94] ss:$12 sps:$4 sm:$0xff]   ;;  %v1254_v24 = vld [vmem:[#allocation2 + $0x90] ss:$12 sps:$4 sm:$0xff]   ;;  %v1256_v25 = vld [vmem:[#allocation2 + $0xac] ss:$12 sps:$4 sm:$0xff]  }
  0x52   :  { %358 = vmatpush1.bf16.msra.mxu1 %v1234_v8  ;;  %v89_v22 = vld [vmem:[%s1716_s1] sm:$0xf]  ;;  %v1231_v23 = vld [vmem:[#allocation2 + $0x8] ss:$12 sps:$4 sm:$0xff]   ;;  %v1239_v27 = vld [vmem:[#allocation2 + $0x38] ss:$12 sps:$4 sm:$0xff]  }
  0x53   :  { %359 = vmatprep.subr.bf16.mxu1 %v1236_v9  ;;  %v1235_v26 = vld [vmem:[#allocation2 + $0x20] ss:$12 sps:$4 sm:$0xff]   ;;  %v1243_v28 = vld [vmem:[#allocation2 + $0x50] ss:$12 sps:$4 sm:$0xff]   ;;  %v1247_v29 = vld [vmem:[#allocation2 + $0x68] ss:$12 sps:$4 sm:$0xff]  }
  0x54   :  { %1090 = vmatpush3.bf16.msra.mxu0 %v1222_v3  ;;  %v1251_v30 = vld [vmem:[#allocation2 + $0x80] ss:$12 sps:$4 sm:$0xff]   ;;  %v1255_v31 = vld [vmem:[#allocation2 + $0x98] ss:$12 sps:$4 sm:$0xff]   ;;  %v1258_v32 = vld [vmem:[#allocation2 + $0xa8] ss:$12 sps:$4 sm:$0xff]  }
  0x55   :  { %1091 = vmatprep.subr.bf16.mxu0 %v1436_v0  ;;  %v1259_v33 = vld [vmem:[#allocation2 + $0xb0] ss:$12 sps:$4 sm:$0xff]   ;;  %v1260_v36 = vld [vmem:[#allocation5] sm:$0xff]   ;;  %v1261_v41 = vld [vmem:[#allocation5 + $0x8] sm:$0xff]   ;;  %s1440_s28 = smov [#allocation10]   ;;  %vm946_vm6 = vcmask 48128  }
  0x56   :  { %360 = vmatpush1.bf16.msra.mxu1 %v1238_v11  ;;  %v1262_v42 = vld [vmem:[#allocation5 + $0x10] sm:$0xff]   ;;  %v1263_v43 = vld [vmem:[#allocation5 + $0x18] sm:$0xff]   ;;  %v1264_v44 = vld [vmem:[#allocation5 + $0x20] sm:$0xff]   ;;  %s955_s2 = sshll.u32 %s1440_s28, 4  ;;  %s956_s2 = int_to_ptr.vmem [resolvable:$true] %s955_s2 }
  0x57   :  { %361 = vmatprep.subr.bf16.mxu1 %v1240_v12  ;;  %v1265_v45 = vld [vmem:[#allocation5 + $0x28] sm:$0xff]   ;;  %v1266_v46 = vld [vmem:[#allocation5 + $0x30] sm:$0xff]   ;;  %v1267_v47 = vld [vmem:[#allocation5 + $0x38] sm:$0xff]   ;;  %s1398_s24 = scalar_lea.vmem %s956_s2, 128  ;;  %p1403_p5 = scmp.lt.s32.totalorder %s956_s2, %s956_s2 }
  0x58   :  { %1092 = vmatpush3.bf16.msra.mxu0 %v1223_v6  ;;  %v1268_v48 = vld [vmem:[#allocation7] sm:$0xff]   ;;  %v1269_v49 = vld [vmem:[#allocation7 + $0x8] sm:$0xff]   ;;  %v1270_v50 = vld [vmem:[#allocation7 + $0x10] sm:$0xff]   ;;  %p1399_p4 = scmp.ne.s32.totalorder %s956_s2, %s1398_s24  ;;  %p1404_p6 = scmp.lt.s32.totalorder %s1398_s24, %s1398_s24 }
  0x59   :  { %1093 = vmatprep.subr.bf16.mxu0 %v1436_v0  ;;  %v1271_v51 = vld [vmem:[#allocation7 + $0x18] sm:$0xff]   ;;  %v1272_v52 = vld [vmem:[#allocation7 + $0x20] sm:$0xff]   ;;  %v1273_v53 = vld [vmem:[#allocation7 + $0x28] sm:$0xff]  }
  0x5a   :  { %362 = vmatpush1.bf16.msra.mxu1 %v1242_v14  ;;  %v1274_v54 = vld [vmem:[#allocation7 + $0x30] sm:$0xff]   ;;  %v1275_v2 = vld [vmem:[#allocation7 + $0x38] sm:$0xff]   ;;  %p1405_p7 = por %p1404_p6, %p1403_p5 }
  0x5b   :  { %363 = vmatprep.subr.bf16.mxu1 %v1244_v15 }
  0x5c   :  { %1094 = vmatpush3.bf16.msra.mxu0 %v1224_v10  ;;  %p1406_p8 = pnand %p1405_p7, %p1399_p4 }
  0x5d   :  { %1095 = vmatprep.subr.bf16.mxu0 %v1436_v0 }
  0x5e   :  { %364 = vmatpush1.bf16.msra.mxu1 %v1246_v18  ;;  %v1277_v18 = vld [vmem:[#allocation8 + $0x8] sm:$0xff]  }
  0x5f   :  { %365 = vmatprep.subr.bf16.mxu1 %v1248_v19  ;;  %v1278_v19 = vld [vmem:[#allocation8 + $0x10] sm:$0xff]  }
  0x60   :  { %1096 = vmatpush3.bf16.msra.mxu0 %v1225_v13 }
  0x61   :  { %1097 = vmatprep.subr.bf16.mxu0 %v1436_v0 }
  0x62   :  { %366 = vmatpush1.bf16.msra.mxu1 %v1250_v20  ;;  %v1279_v20 = vld [vmem:[#allocation8 + $0x18] sm:$0xff]  }
  0x63   :  { %367 = vmatprep.subr.bf16.mxu1 %v1252_v21  ;;  %v1280_v21 = vld [vmem:[#allocation8 + $0x20] sm:$0xff]  }
  0x64   :  { %1098 = vmatpush3.bf16.msra.mxu0 %v1226_v16 }
  0x65   :  { %1099 = vmatprep.subr.bf16.mxu0 %v1436_v0 }
  0x66   :  { %368 = vmatpush1.bf16.msra.mxu1 %v1254_v24  ;;  %v1283_v24 = vld [vmem:[#allocation8 + $0x38] sm:$0xff]  }
  0x67   :  { %369 = vmatprep.subr.bf16.mxu1 %v1256_v25  ;;  %v1284_v25 = vld [vmem:[%s1721_s6] sm:$0xff]  }
  0x68   :  { %1100 = vmatpush3.bf16.msra.mxu0 %v1227_v17  ;;  %v1276_v17 = vld [vmem:[#allocation8] sm:$0xff]  }
  0x69   :  { %1105 = vmatprep.subr.bf16.mxu0 %v1436_v0 }
  0x6a   :  { %370 = vmatpush1.bf16.msra.mxu1 %v1258_v32 }
  0x6b   :  { %1102 = vmatmul.mubr.bf16.vlgmr.msra.gmra.mrb[0].mxu0 %v89_v22  ;;  %1125 = vmatprep.subr.bf16.mxu1 %v1436_v0  ;;  %v1281_v22 = vld [vmem:[#allocation8 + $0x28] sm:$0xff]  }
  0x6c   :  { %1106 = vmatpush3.bf16.msra.mxu0 %v1231_v23  ;;  %1121 = vmatprep.mubr.msk.bf16.mxu0 %vm1437_vm0, %v1436_v0  ;;  %v1282_v23 = vld [vmem:[#allocation8 + $0x30] sm:$0xff]  }
  0x6d   :  { %1107 = vmatprep.subr.bf16.mxu0 %v1436_v0 }
  0x70   :  { %1108 = vmatpush3.bf16.msra.mxu0 %v1235_v26  ;;  %v1285_v26 = vld [vmem:[%s1721_s6 + $0x8] sm:$0xff]  }
  0x71   :  { %1109 = vmatprep.subr.bf16.mxu0 %v1436_v0 }
  0x74   :  { %1110 = vmatpush3.bf16.msra.mxu0 %v1239_v27  ;;  %v1286_v27 = vld [vmem:[%s1721_s6 + $0x10] sm:$0xff]  }
  0x75   :  { %1111 = vmatprep.subr.bf16.mxu0 %v1436_v0 }
  0x78   :  { %1112 = vmatpush3.bf16.msra.mxu0 %v1243_v28  ;;  %v1287_v28 = vld [vmem:[%s1721_s6 + $0x18] sm:$0xff]  }
  0x79   :  { %1113 = vmatprep.subr.bf16.mxu0 %v1436_v0 }
  0x7c   :  { %1114 = vmatpush3.bf16.msra.mxu0 %v1247_v29  ;;  %v1288_v29 = vld [vmem:[%s1721_s6 + $0x20] sm:$0xff]  }
  0x7d   :  { %1115 = vmatprep.subr.bf16.mxu0 %v1436_v0 }
  0x80   :  { %1116 = vmatpush3.bf16.msra.mxu0 %v1251_v30  ;;  %v1289_v30 = vld [vmem:[%s1721_s6 + $0x28] sm:$0xff]  }
  0x81   :  { %1117 = vmatprep.subr.bf16.mxu0 %v1436_v0 }
  0x84   :  { %1118 = vmatpush3.bf16.msra.mxu0 %v1255_v31  ;;  %v1290_v31 = vld [vmem:[%s1721_s6 + $0x30] sm:$0xff]  }
  0x85   :  { %1119 = vmatprep.subr.bf16.mxu0 %v1436_v0 }
  0x88   :  { %1120 = vmatpush3.bf16.msra.mxu0 %v1259_v33 }
  0x89   :  { %1145 = vmatprep.subr.bf16.mxu0 %v1436_v0 }
 0x13e   :  { %v188_v35 = vpop.f32.mrb[0].mxu0 }
 0x13f   :  { %v194_v37 = vpack.c.bf16 %v188_v35, %v188_v35  ;;  %v1103_v38 = vpop.f32.mrb[1].mxu0 }
 0x140   :  { %v191_v39 = vpop.f32.mrb[2].mxu0 }
 0x141   :  { %v1104_v40 = vpop.f32.mrb[3].mxu0  ;;  %388 = vmatmul.mubr.bf16.vlgmr.msra.gmra.mrb[0].mxu1 %v194_v37  ;;  %1122 = vmatmul.mubr.bf16.vlgmr.msra.gmra.mrb[4].mxu0 %v194_v37 }
 0x142   :  { %1126 = vmatpush3.bf16.msra.mxu1 %v1260_v36  ;;  %1141 = vmatprep.mubr.msk.bf16.mxu1 %vm1437_vm0, %v1436_v0 }
 0x143   :  { %1127 = vmatprep.subr.bf16.mxu1 %v1436_v0  ;;  %1161 = vmatprep.mubr.msk.bf16.mxu0 %vm1437_vm0, %v1436_v0 }
 0x144   :  { %1146 = vmatpush3.bf16.msra.mxu0 %v1268_v48 }
 0x145   :  { %1147 = vmatprep.subr.bf16.mxu0 %v1436_v0 }
 0x146   :  { %1128 = vmatpush3.bf16.msra.mxu1 %v1261_v41 }
 0x147   :  { %1129 = vmatprep.subr.bf16.mxu1 %v1436_v0 }
 0x148   :  { %1148 = vmatpush3.bf16.msra.mxu0 %v1269_v49 }
 0x149   :  { %1149 = vmatprep.subr.bf16.mxu0 %v1436_v0 }
 0x14a   :  { %1130 = vmatpush3.bf16.msra.mxu1 %v1262_v42 }
 0x14b   :  { %1131 = vmatprep.subr.bf16.mxu1 %v1436_v0 }
 0x14c   :  { %1150 = vmatpush3.bf16.msra.mxu0 %v1270_v50 }
 0x14d   :  { %1151 = vmatprep.subr.bf16.mxu0 %v1436_v0 }
 0x14e   :  { %1132 = vmatpush3.bf16.msra.mxu1 %v1263_v43 }
 0x14f   :  { %1133 = vmatprep.subr.bf16.mxu1 %v1436_v0 }
 0x150   :  { %1152 = vmatpush3.bf16.msra.mxu0 %v1271_v51 }
 0x151   :  { %1153 = vmatprep.subr.bf16.mxu0 %v1436_v0 }
 0x152   :  { %1134 = vmatpush3.bf16.msra.mxu1 %v1264_v44 }
 0x153   :  { %1135 = vmatprep.subr.bf16.mxu1 %v1436_v0 }
 0x154   :  { %1154 = vmatpush3.bf16.msra.mxu0 %v1272_v52 }
 0x155   :  { %1155 = vmatprep.subr.bf16.mxu0 %v1436_v0 }
 0x156   :  { %1136 = vmatpush3.bf16.msra.mxu1 %v1265_v45 }
 0x157   :  { %1137 = vmatprep.subr.bf16.mxu1 %v1436_v0 }
 0x158   :  { %1156 = vmatpush3.bf16.msra.mxu0 %v1273_v53 }
 0x159   :  { %1157 = vmatprep.subr.bf16.mxu0 %v1436_v0 }
 0x15a   :  { %1138 = vmatpush3.bf16.msra.mxu1 %v1266_v46 }
 0x15b   :  { %1139 = vmatprep.subr.bf16.mxu1 %v1436_v0 }
 0x15c   :  { %1158 = vmatpush3.bf16.msra.mxu0 %v1274_v54 }
 0x15d   :  { %1159 = vmatprep.subr.bf16.mxu0 %v1436_v0 }
 0x15e   :  { %1140 = vmatpush3.bf16.msra.mxu1 %v1267_v47 }
 0x15f   :  { %1165 = vmatprep.subr.bf16.mxu1 %v1436_v0 }
 0x160   :  { %1160 = vmatpush3.bf16.msra.mxu0 %v1275_v2 }
 0x161   :  { %1185 = vmatprep.subr.bf16.mxu0 %v1436_v0 }
 0x214   :  { %v389_v55 = vpop.f32.mrb[0].mxu1  ;;  %v430_v56 = vpop.f32.mrb[4].mxu0 }
 0x215   :  { %v391_v57 = vpop.f32.mrb[1].mxu1  ;;  %v1123_v58 = vpop.f32.mrb[5].mxu0  ;;  %1292 = vtanh.f32 %v430_v56 }
 0x216   :  { %v393_v59 = vpop.f32.mrb[2].mxu1  ;;  %v433_v60 = vpop.f32.mrb[6].mxu0  ;;  %1294 = vtanh.f32 %v389_v55 }
 0x217   :  { %v394_v61 = vpop.f32.mrb[3].mxu1  ;;  %v1124_v62 = vpop.f32.mrb[7].mxu0  ;;  %1296 = vtanh.f32 %v391_v57  ;;  %v1291_v60 = vld [vmem:[%s1721_s6 + $0x38] sm:$0xff]   ;;  %s1439_s6 = smov 1  }
 0x21f   :  { %v1623_v63 = vpop.eup %1292 }
 0x220   :  { %v439_v1 = vpack.c.bf16 %v1623_v63, %v1623_v63  ;;  %v1632_v8 = vpop.eup %1294 }
 0x221   :  { %v1636_v15 = vpop.eup %1296 }
 0x222   :  { %1142 = vmatmul.mubr.bf16.vlgmr.msra.gmra.mrb[4].mxu1 %v439_v1 }
 0x223   :  { %1181 = vmatprep.mubr.msk.bf16.mxu1 %vm1437_vm0, %v1436_v0  ;;  %1166 = vmatpush3.bf16.msra.mxu1 %v1276_v17 }
 0x224   :  { %1167 = vmatprep.subr.bf16.mxu1 %v1436_v0 }
 0x227   :  { %1168 = vmatpush3.bf16.msra.mxu1 %v1277_v18 }
 0x228   :  { %1169 = vmatprep.subr.bf16.mxu1 %v1436_v0 }
 0x22b   :  { %1170 = vmatpush3.bf16.msra.mxu1 %v1278_v19 }
 0x22c   :  { %1171 = vmatprep.subr.bf16.mxu1 %v1436_v0 }
 0x22f   :  { %1172 = vmatpush3.bf16.msra.mxu1 %v1279_v20 }
 0x230   :  { %1173 = vmatprep.subr.bf16.mxu1 %v1436_v0 }
 0x233   :  { %1174 = vmatpush3.bf16.msra.mxu1 %v1280_v21 }
 0x234   :  { %1175 = vmatprep.subr.bf16.mxu1 %v1436_v0 }
 0x237   :  { %1176 = vmatpush3.bf16.msra.mxu1 %v1281_v22 }
 0x238   :  { %1177 = vmatprep.subr.bf16.mxu1 %v1436_v0 }
 0x23b   :  { %1178 = vmatpush3.bf16.msra.mxu1 %v1282_v23 }
 0x23c   :  { %1179 = vmatprep.subr.bf16.mxu1 %v1436_v0 }
 0x23f   :  { %1180 = vmatpush3.bf16.msra.mxu1 %v1283_v24 }
 0x2f5   :  { %v538_v3 = vpop.f32.mrb[4].mxu1 }
 0x2f6   :  { %v544_v4 = vpack.c.bf16 %v538_v3, %v538_v3  ;;  %v1143_v5 = vpop.f32.mrb[5].mxu1 }
 0x2f7   :  { %v541_v6 = vpop.f32.mrb[6].mxu1 }
 0x2f8   :  { %v1144_v7 = vpop.f32.mrb[7].mxu1  ;;  %1162 = vmatmul.mubr.bf16.vlgmr.msra.gmra.mrb[8].mxu0 %v544_v4  ;;  %v1022_v4 = vld [vmem:[%s1722_s7] ss:$0 sm:$0xff] }
 0x2f9   :  { %1201 = vmatprep.mubr.msk.bf16.mxu0 %vm1437_vm0, %v1436_v0  ;;  %1186 = vmatpush3.bf16.msra.mxu0 %v1284_v25 }
 0x2fa   :  { %1187 = vmatprep.subr.bf16.mxu0 %v1436_v0 }
 0x2fd   :  { %1188 = vmatpush3.bf16.msra.mxu0 %v1285_v26 }
 0x2fe   :  { %1189 = vmatprep.subr.bf16.mxu0 %v1436_v0 }
 0x301   :  { %1190 = vmatpush3.bf16.msra.mxu0 %v1286_v27 }
 0x302   :  { %1191 = vmatprep.subr.bf16.mxu0 %v1436_v0 }
 0x305   :  { %1192 = vmatpush3.bf16.msra.mxu0 %v1287_v28 }
 0x306   :  { %1193 = vmatprep.subr.bf16.mxu0 %v1436_v0 }
 0x309   :  { %1194 = vmatpush3.bf16.msra.mxu0 %v1288_v29 }
 0x30a   :  { %1195 = vmatprep.subr.bf16.mxu0 %v1436_v0 }
 0x30d   :  { %1196 = vmatpush3.bf16.msra.mxu0 %v1289_v30 }
 0x30e   :  { %1197 = vmatprep.subr.bf16.mxu0 %v1436_v0 }
 0x311   :  { %1198 = vmatpush3.bf16.msra.mxu0 %v1290_v31 }
 0x312   :  { %1199 = vmatprep.subr.bf16.mxu0 %v1436_v0 }
 0x315   :  { %1200 = vmatpush3.bf16.msra.mxu0 %v1291_v60 }
 0x3cb   :  { %v643_v9 = vpop.f32.mrb[8].mxu0 }
 0x3cc   :  { %v1163_v10 = vpop.f32.mrb[9].mxu0  ;;  %v657_v11 = vmul.f32 %v1623_v63, %v643_v9  ;;  %v649_v12 = vmul.f32 %v1632_v8, %v643_v9  ;;  %v653_v16 = vmul.f32 %v1636_v15, %v643_v9 }
 0x3cd   :  { %v646_v13 = vpop.f32.mrb[10].mxu0 }
 0x3ce   :  { %658 = vadd.xlane.f32.xlu1 %v657_v11  ;;  %650 = vadd.xlane.f32.xlu0 %v649_v12  ;;  %v1164_v14 = vpop.f32.mrb[11].mxu0 }
 0x3d2   :  { %654 = vadd.xlane.f32.xlu0 %v653_v16 }
 0x45b   :  { %v651_v32 = vpop.xlane.xlu0 %650  ;;  %v659_v33 = vpop.xlane.xlu1 %658 }
 0x45c   :  { %v652_v35 = vmul.f32 0.088388346, %v651_v32  ;;  %v660_v37 = vmul.f32 0.088388346, %v659_v33 }
 0x45f   :  { %v655_v34 = vpop.xlane.xlu0 %654 }
 0x460   :  { %v656_v36 = vmul.f32 0.088388346, %v655_v34 }
 0x462   :  { %v661_v38 = vmax.f32 %v652_v35, %v656_v36 }
 0x464   :  { %v662_v39 = vmax.f32 %v661_v38, %v660_v37 }
 0x466   :  { %v663_v40 = vsub.f32 %v652_v35, %v662_v39  ;;  %v666_v41 = vsub.f32 %v656_v36, %v662_v39  ;;  %v669_v42 = vsub.f32 %v660_v37, %v662_v39 }
 0x468   :  { %v664_v43 = vmul.f32 1.442695, %v663_v40  ;;  %v667_v44 = vmul.f32 1.442695, %v666_v41  ;;  %v670_v45 = vmul.f32 1.442695, %v669_v42 }
 0x46a   :  { %1298 = vpow2.f32 %v664_v43 }
 0x46b   :  { %1300 = vpow2.f32 %v667_v44 }
 0x46c   :  { %1302 = vpow2.f32 %v670_v45 }
 0x474   :  { %v1299_v46 = vpop.eup %1298 }
 0x475   :  { %v1301_v47 = vpop.eup %1300 }
 0x476   :  { %v672_v0 = vadd.f32 %v1301_v47, %v1299_v46  ;;  %v1303_v48 = vpop.eup %1302 }
 0x478   :  { %v673_v49 = vadd.f32 %v1303_v48, %v672_v0 }
 0x47a   :  { %1304 = vrcp.f32 %v673_v49 }
 0x484   :  { %v1305_v50 = vpop.eup %1304 }
 0x485   :  { %v1674_v51 = vmul.f32 %v1305_v50, %v1299_v46  ;;  %v1676_v52 = vmul.f32 %v1305_v50, %v1301_v47  ;;  %v1678_v53 = vmul.f32 %v1305_v50, %v1303_v48 }
 0x487   :  { %v678_v54 = vmul.f32 %v1632_v8, %v1674_v51  ;;  %v679_v55 = vmul.f32 %v1636_v15, %v1676_v52  ;;  %v681_v57 = vmul.f32 %v1623_v63, %v1678_v53  ;;  %v913_v63 = vld [vmem:[%s1723_s8] sm:$0xff] }
 0x489   :  { %v680_v56 = vadd.f32 %v679_v55, %v678_v54 }
 0x48b   :  { %v682_v58 = vadd.f32 %v681_v57, %v680_v56 }
 0x48d   :  { %v683_v59 = vpack.c.bf16 %v682_v58, %v682_v58 }
 0x48f   :  { %1182 = vmatmul.mubr.bf16.vlgmr.msra.gmra.mrb[8].mxu1 %v683_v59 }
 0x562   :  { %v782_v61 = vpop.f32.mrb[8].mxu1 }
 0x563   :  { %v788_v62 = vpack.c.bf16 %v782_v61, %v782_v61  ;;  %v1183_v1 = vpop.f32.mrb[9].mxu1 }
 0x564   :  { %v785_v2 = vpop.f32.mrb[10].mxu1 }
 0x565   :  { %v1184_v3 = vpop.f32.mrb[11].mxu1  ;;  %1202 = vmatmul.mubr.bf16.vlgmr.msra.gmra.mrb[12].mxu0 %v788_v62 }
 0x638   :  { %v894_v5 = vpop.f32.mrb[12].mxu0 }
 0x639   :  { %v895_v6 = vadd.f32 %v1022_v4, %v894_v5  ;;  %v1203_v7 = vpop.f32.mrb[13].mxu0 }
 0x63a   :  { %v897_v8 = vpop.f32.mrb[14].mxu0 }
 0x63b   :  { %v1204_v9 = vpop.f32.mrb[15].mxu0  ;;  %v901_v10 = vsel %vm900_vm1, %v895_v6, -inf  ;;  %v914_v11 = vmul.f32 %v913_v63, %v895_v6 }
 0x63c   :  { %902 = vmax.xlane.f32.xlu1 %v901_v10 }
 0x63d   :  { %v915_v12 = vsel %vm900_vm1, %v914_v11, 0.0 }
 0x640   :  { %916 = vadd.xlane.f32.xlu1 %v915_v12 }
 0x651   :  { %936 = vrot.lane.b32.xlu1 %v895_v6, %s1439_s6 }
 0x6c9   :  { %v903_v13 = vpop.xlane.xlu1 %902 }
 0x6ca   :  { %v904_v14 = vsub.f32 %v895_v6, %v903_v13 }
 0x6cc   :  { %v905_v15 = vmul.f32 1.442695, %v904_v14 }
 0x6cd   :  { %v917_v22 = vpop.xlane.xlu1 %916 }
 0x6ce   :  { %1306 = vpow2.f32 %v905_v15 }
 0x6d1   :  { %v937_v32 = vpop.permute.xlu1 %936 }
 0x6d8   :  { %v1307_v16 = vpop.eup %1306 }
 0x6d9   :  { %v907_v17 = vsel %vm900_vm1, %v1307_v16, 0.0 }
 0x6da   :  { %908 = vadd.xlane.f32.xlu0 %v907_v17 }
 0x767   :  { %v909_v18 = vpop.xlane.xlu0 %908 }
 0x768   :  { %1308 = vlog2.f32 %v909_v18 }
 0x772   :  { %v1309_v19 = vpop.eup %1308 }
 0x773   :  { %v911_v20 = vmul.f32 0.6931472, %v1309_v19 }
 0x775   :  { %v912_v21 = vadd.f32 %v911_v20, %v903_v13 }
 0x777   :  { %v918_v23 = vsub.f32 %v912_v21, %v917_v22 }
 0x779   :  { %v920_v24 = vsel %vm919_vm2, %v918_v23, 0.0 }
 0x77a   :  { %921 = vadd.xlane.f32.xlu0 %v920_v24 }
 0x807   :  { %v922_v25 = vpop.xlane.xlu0 %921 }
 0x808   :  { %v923_v26 = vrot.slane %v922_v25, 4 }
 0x80a   :  { %v924_v27 = vadd.f32 %v923_v26, %v922_v25 }
 0x80c   :  { %v925_v28 = vrot.slane %v924_v27, 2 }
 0x80e   :  { %v926_v29 = vadd.f32 %v925_v28, %v924_v27 }
 0x810   :  { %v927_v30 = vrot.slane %v926_v29, 1 }
 0x812   :  { %v928_v31 = vadd.f32 %v927_v30, %v926_v29 }
 0x814   :  { %1205 = vpush %v928_v31 }
 0x845   :  { %s1206_s7 = spop %1205 }
 0x846   :  { %s932_s8 = smul.f32 0.125, %s1206_s7 }
 0x848   :  { %v933_v33 = vstv %s932_s8 }
 0x849   :  { %v939_v34 = vsel %vm919_vm2, %v933_v33, %v937_v32 }
 0x84a   :  { %v941_v35 = vsel %vm940_vm3, %v939_v34, %v1674_v51 }
 0x84b   :  { %v943_v36 = vsel %vm942_vm4, %v941_v35, %v1676_v52 }
 0x84c   :  { %v945_v37 = vsel %vm944_vm5, %v943_v36, %v1678_v53 }
 0x84d   :  { %v947_v38 = vsel %vm946_vm6, %v945_v37, 0.0 }
 0x84e   :  { %948 = vst [vmem:[#allocation10] sm:$0xff] %v947_v38 }
 0x84f   :  { %1409 = shalt.err (!%p1406_p8)
}
 0x850   :  { %s1410_s11 = scalar_lea.hbm %s1724_s9, 128 }
 0x851   :  { %p1411_p9 = scmp.ne.s32.totalorder %s1724_s9, %s1410_s11  ;;  %p1414_p10 = scmp.lt.u32.totalorder %s1410_s11, %s1724_s9 }
 0x853   :  { %p1416_p11 = pnand %p1414_p10, %p1411_p9 }
 0x855   :  { %1419 = shalt.err (!%p1416_p11)
}
 0x856   :  { %958 = dma.vmem_to_hbm [thread:$0]  %s956_s2, 128, %s1724_s9, [#allocation4]  }
 0x857   :  { %1426 = dma.done.wait [#allocation4], 128  }
 0x858   :  { %1427 = vsyncadd [#allocation4], 4294967168 }
 0x859   :  { %962 = vsyncpa [#allocation3], 1 }
 0x85a   :  { %963 = vsyncpa [#allocation6], 1 }
 0x85b   :  { %964 = vsyncpa [#allocation9], 1 }
 0x85c   :  { %965 = vsyncpa [#allocation4], 1 }

</bundles_post_ra>
